<compile_context>
chip_gen: v7x
topology: tpu7x:2x2x1
jax: 0.10.0
libtpu: 0.0.40
codegen_flags: <defaults>
</compile_context>

<pallas_src>
import jax
import jax.numpy as jnp
from jax.experimental import pallas as pl
from jax.experimental.pallas import tpu as pltpu


def _round_up(x: int, m: int) -> int:
    return ((x + m - 1) // m) * m


def _vmem_capacity_bytes() -> int:
    """Generation-aware VMEM capacity; conservative 64 MiB (v7x) fallback."""
    try:
        return int(pltpu.get_tpu_info().vmem_capacity_bytes)
    except Exception:
        return 64 * 1024 * 1024


def sub_mul_nn_kernel(f1_ref, f2_ref, w_ref, b_ref, o_ref):
    f1 = f1_ref[...]                      # (block_b, F), native dtype -> MXU
    f2 = f2_ref[...]
    F = f1.shape[-1]

    if F < 128:
        # Small-F path: one lane-dense (block_b, 3F) activation, single MXU push.
        x = jnp.concatenate([f1, f2, f1 * f2], axis=-1)
        acc = jnp.dot(x, w_ref[...], preferred_element_type=jnp.float32)
    else:
        # Large-F path: static F-aligned Ref slices; sum of three partial
        # matmuls == cat([f1, f2, f1*f2]) @ W_fold.
        acc = jnp.dot(f1, w_ref[pl.ds(0 * F, F), :],
                      preferred_element_type=jnp.float32)
        acc += jnp.dot(f2, w_ref[pl.ds(1 * F, F), :],
                       preferred_element_type=jnp.float32)
        acc += jnp.dot(f1 * f2, w_ref[pl.ds(2 * F, F), :],
                       preferred_element_type=jnp.float32)

    # bias is already f32 (1, block_o): single fused add + cast + store.
    o_ref[...] = (acc + b_ref[...]).astype(o_ref.dtype)


def prepare_params(weight, bias):
    """One-time parameter prep (do at init, NOT per call).

    weight: PyTorch-layout (O, 4F); bias: (O,).
    Returns (w_fold, b2d, out_features):
      w_fold : (3F, O_pad) = [W1+W3; W2-W3; W4] (transposed, folded, lane-padded)
      b2d    : (1, O_pad) float32
      O_pad  = round_up(O, 128) for lane-dense output stores.
    """
    out_features, k4 = weight.shape
    F = k4 // 4
    o_pad = _round_up(out_features, 128)

    w_t = jnp.transpose(weight)                          # (4F, O), done once
    w1 = w_t[0 * F:1 * F]
    w2 = w_t[1 * F:2 * F]
    w3 = w_t[2 * F:3 * F]
    w4 = w_t[3 * F:4 * F]
    # Fold the (f1 - f2) term into the weight: K shrinks from 4F to 3F.
    w_fold = jnp.concatenate([w1 + w3, w2 - w3, w4], axis=0)   # (3F, O)

    if o_pad != out_features:
        w_fold = jnp.pad(w_fold, ((0, 0), (0, o_pad - out_features)))
        bias = jnp.pad(bias, (0, o_pad - out_features))
    b2d = bias.astype(jnp.float32).reshape(1, o_pad)
    return w_fold, b2d, out_features


def sub_mul_nn(feat_1, feat_2, w_fold, b2d, out_features, *,
               block_b=None, block_o=None, return_padded=False):
    """feat_1, feat_2: (B, F).  w_fold: (3F, O_pad), b2d: (1, O_pad) from
    prepare_params.  Returns (B, out_features) (or (B, O_pad) if return_padded)."""
    B, F = feat_1.shape
    K3, O_pad = w_fold.shape
    assert K3 == 3 * F, "weight must be (3F, O_pad) from prepare_params"
    w_bytes = jnp.dtype(w_fold.dtype).itemsize
    x_bytes = jnp.dtype(feat_1.dtype).itemsize

    vmem_cap = _vmem_capacity_bytes()

    # --- block_o: the weight is the largest operand; budget ~40% of VMEM -----
    if block_o is None:
        w_budget = int(vmem_cap * 0.4)
        max_bo = max(128, (w_budget // (2 * 3 * F * w_bytes)) // 128 * 128)
        block_o = min(O_pad, max_bo)

    # --- block_b: amortize ~0.35us/step overhead; budget what VMEM allows ----
    if block_b is None:
        usable = int(vmem_cap * 0.75)
        w_resident = 2 * (3 * F * block_o * w_bytes + block_o * 4)
        rem = max(usable - w_resident, 4 << 20)
        per_row = (4 * F * x_bytes           # f1 + f2, double-buffered
                   + 2 * block_o * x_bytes   # output tile, double-buffered
                   + block_o * 4             # f32 accumulator
                   + 3 * F * x_bytes)        # concat activation (small-F path)
        max_bb = max(8, int(rem // per_row) // 8 * 8)
        cap = min(2048, max_bb)
        block_b = B if B <= cap else cap

    n_o = pl.cdiv(O_pad, block_o)
    n_b = pl.cdiv(B, block_b)

    # v7x megacore: guarantee >=2 grid steps on a parallel axis when possible.
    if n_o * n_b == 1:
        if block_b >= 16:
            block_b = _round_up((block_b + 1) // 2, 8)
        elif block_o >= 256:
            block_o = max(128, (block_o // 2) // 128 * 128)
        n_o = pl.cdiv(O_pad, block_o)
        n_b = pl.cdiv(B, block_b)

    # Weight block index depends only on the OUTER grid axis: it is DMA'd once
    # per O tile.  When it is large and the batch axis has >1 step, single-
    # buffer it to halve its resident VMEM footprint.
    w_block_bytes = 3 * F * block_o * w_bytes
    single_buffer_w = (n_b > 1) and (w_block_bytes > (8 << 20))
    w_spec = (pl.BlockSpec((3 * F, block_o), lambda j, i: (0, j),
                           pipeline_mode=pl.Buffered(1))
              if single_buffer_w else
              pl.BlockSpec((3 * F, block_o), lambda j, i: (0, j)))

    # Real footprint (+ headroom), capped at ~3/4 of this generation's VMEM
    # (~48 MiB on v7x, ~96 MiB on v5e/v6e).
    footprint = ((1 if single_buffer_w else 2) * w_block_bytes
                 + 2 * block_o * 4                        # f32 bias, dbl-buffered
                 + 2 * 2 * block_b * F * x_bytes          # f1, f2
                 + 2 * block_b * block_o * x_bytes        # output
                 + block_b * block_o * 4                  # f32 accumulator
                 + block_b * 3 * F * x_bytes)             # concat scratch
    vmem_limit = int(max(32 << 20, min(footprint + (8 << 20), vmem_cap * 3 // 4)))

    out = pl.pallas_call(
        sub_mul_nn_kernel,
        out_shape=jax.ShapeDtypeStruct((B, O_pad), feat_1.dtype),
        grid_spec=pltpu.PrefetchScalarGridSpec(
            num_scalar_prefetch=0,
            grid=(n_o, n_b),   # O tiles on the OUTER (slow) axis, batch inner
            in_specs=[
                pl.BlockSpec((block_b, F), lambda j, i: (i, 0)),    # feat_1
                pl.BlockSpec((block_b, F), lambda j, i: (i, 0)),    # feat_2
                w_spec,                                             # weight (3F, bo)
                pl.BlockSpec((1, block_o), lambda j, i: (0, j)),    # bias (f32)
            ],
            out_specs=pl.BlockSpec((block_b, block_o), lambda j, i: (i, j)),
        ),
        compiler_params=pltpu.CompilerParams(
            dimension_semantics=("parallel", "parallel"),
            vmem_limit_bytes=vmem_limit),
    )(feat_1, feat_2, w_fold, b2d)

    if return_padded or O_pad == out_features:
        return out
    # NOTE: this slice is an extra HBM pass over the output (XLA copy); pass
    # return_padded=True and fuse/slice in the consumer to avoid it.
    return out[:, :out_features]


def sub_mul_nn_ref(feat_1, feat_2, weight, bias):
    x = jnp.concatenate(
        [feat_1, feat_2, feat_1 - feat_2, feat_1 * feat_2], axis=-1)
    return x @ weight.T + bias


if __name__ == "__main__":
    # Small shapes consistent with the module's forward.
    B = 8          # batch
    F = 32         # feat_size
    O = 32         # output_size

    key = jax.random.PRNGKey(0)
    k1, k2, kw, kb = jax.random.split(key, 4)

    feat_1 = jax.random.normal(k1, (B, F), dtype=jnp.float32)
    feat_2 = jax.random.normal(k2, (B, F), dtype=jnp.float32)

    # Deterministic Linear(feat_size*4, output_size) params (PyTorch layout).
    bound = 1.0 / jnp.sqrt(4.0 * F)
    weight = jax.random.uniform(kw, (O, 4 * F), jnp.float32, -bound, bound)
    bias = jax.random.uniform(kb, (O,), jnp.float32, -bound, bound)

    # One-time parameter prep (transpose + fold + lane padding); not hot path.
    w_fold, b2d, out_features = prepare_params(weight, bias)

    out = sub_mul_nn(feat_1, feat_2, w_fold, b2d, out_features)
    out = jax.block_until_ready(out)

    ref = sub_mul_nn_ref(feat_1, feat_2, weight, bias)
    assert out.shape == (B, O)
    # Tolerance allows for the fp reassociation introduced by the weight fold.
    assert jnp.allclose(out, ref, atol=1e-4, rtol=1e-4), "mismatch vs reference"

    print("KERNEL_OK")
</pallas_src>

<mosaic_0001>
module attributes {stable_mosaic.version = 11 : i64} {
  func.func @sub_mul_nn_kernel(%arg0: i32, %arg1: i32, %arg2: memref<8x32xf32, #tpu.memory_space<vmem>>, %arg3: memref<8x32xf32, #tpu.memory_space<vmem>>, %arg4: memref<96x128xf32, #tpu.memory_space<vmem>>, %arg5: memref<1x128xf32, #tpu.memory_space<vmem>>, %arg6: memref<8x128xf32, #tpu.memory_space<vmem>>) attributes {dimension_semantics = [#tpu.dimension_semantics<parallel>, #tpu.dimension_semantics<parallel>], iteration_bounds = array<i64: 1, 1>, scalar_prefetch = 0 : i64, scratch_operands = 0 : i64, tpu.core_type = #tpu.core_type<tc>, window_params = [{transform_indices = @transform_0, window_bounds = array<i64: 8, 32>}, {transform_indices = @transform_1, window_bounds = array<i64: 8, 32>}, {transform_indices = @transform_2, window_bounds = array<i64: 96, 128>}, {transform_indices = @transform_3, window_bounds = array<i64: 1, 128>}, {transform_indices = @transform_4, window_bounds = array<i64: 8, 128>}]} {
    %c0 = arith.constant 0 : index
    %c0_0 = arith.constant 0 : index
    %0 = vector.load %arg2[%c0, %c0_0] : memref<8x32xf32, #tpu.memory_space<vmem>>, vector<8x32xf32>
    %c0_1 = arith.constant 0 : index
    %c0_2 = arith.constant 0 : index
    %1 = vector.load %arg3[%c0_1, %c0_2] : memref<8x32xf32, #tpu.memory_space<vmem>>, vector<8x32xf32>
    %2 = arith.mulf %0, %1 : vector<8x32xf32>
    %3 = tpu.concatenate %0, %1, %2 in 1 : vector<8x32xf32>, vector<8x32xf32>, vector<8x32xf32> -> vector<8x96xf32>
    %c0_3 = arith.constant 0 : index
    %c0_4 = arith.constant 0 : index
    %4 = vector.load %arg4[%c0_3, %c0_4] : memref<96x128xf32, #tpu.memory_space<vmem>>, vector<96x128xf32>
    %cst = arith.constant dense<0.000000e+00> : vector<8x128xf32>
    %5 = tpu.matmul %3, %4, %cst {dimension_numbers = #tpu.dot_dimension_numbers<[1], [0], [0], [1], [0, 0, 1, 1], [], []>} : vector<8x96xf32>, vector<96x128xf32>, vector<8x128xf32> -> vector<8x128xf32>
    %c0_5 = arith.constant 0 : index
    %c0_6 = arith.constant 0 : index
    %6 = vector.load %arg5[%c0_5, %c0_6] : memref<1x128xf32, #tpu.memory_space<vmem>>, vector<1x128xf32>
    %7 = vector.broadcast %6 : vector<1x128xf32> to vector<8x128xf32>
    %8 = arith.addf %5, %7 : vector<8x128xf32>
    %c0_7 = arith.constant 0 : index
    %c0_8 = arith.constant 0 : index
    %9 = vector.load %arg6[%c0_7, %c0_8] : memref<8x128xf32, #tpu.memory_space<vmem>>, vector<8x128xf32>
    tpu.vector_store %arg6[%c0_7, %c0_8], %8 {strides = array<i32>} : memref<8x128xf32, #tpu.memory_space<vmem>>, vector<8x128xf32>,
    return
  }
  func.func @transform_0(%arg0: i32, %arg1: i32) -> (i32, i32) {
    %c0_i32 = arith.constant 0 : i32
    %c0_i32_0 = arith.constant 0 : i32
    return %arg1, %c0_i32 : i32, i32
  }
  func.func @transform_1(%arg0: i32, %arg1: i32) -> (i32, i32) {
    %c0_i32 = arith.constant 0 : i32
    %c0_i32_0 = arith.constant 0 : i32
    return %arg1, %c0_i32 : i32, i32
  }
  func.func @transform_2(%arg0: i32, %arg1: i32) -> (i32, i32) {
    %c0_i32 = arith.constant 0 : i32
    %c0_i32_0 = arith.constant 0 : i32
    return %c0_i32, %arg0 : i32, i32
  }
  func.func @transform_3(%arg0: i32, %arg1: i32) -> (i32, i32) {
    %c0_i32 = arith.constant 0 : i32
    %c0_i32_0 = arith.constant 0 : i32
    return %c0_i32, %arg0 : i32, i32
  }
  func.func @transform_4(%arg0: i32, %arg1: i32) -> (i32, i32) {
    %c0_i32 = arith.constant 0 : i32
    return %arg1, %arg0 : i32, i32
  }
}

</mosaic_0001>

<bundles_post_ra>
// kernel: tpu_custom_call.1
= control target key start
LH: loop header
LB: loop body
LE: loop exit
PB: predicated region body
PF: predicated region fallthrough
CT: control target
= control target key end

     0   :  { %9 = vsyncpa [#allocation3], 0  ;;  %s432_s0 = inlined_call_operand.hbm [shape: f32[8,32], index: 0, kind: input, shape index: {}]   ;;  %s433_s1 = inlined_call_operand.hbm [shape: f32[8,32], index: 1, kind: input, shape index: {}]   ;;  %s434_s2 = inlined_call_operand.hbm [shape: f32[96,128], index: 2, kind: input, shape index: {}]   ;;  %s435_s3 = inlined_call_operand.vmem [shape: f32[1,128], index: 3, kind: input, shape index: {}]   ;;  %s436_s4 = inlined_call_operand.hbm [shape: f32[8,128], index: 4, kind: output, shape index: {}]  }
   0x1   :  { %10 = vsyncpa [#allocation6], 0 }
   0x2   :  { %11 = vsyncpa [#allocation4], 0  ;;  %s345_s15 = smov [#allocation5]   ;;  %s346_s17 = smov [#allocation2]  }
   0x3   :  { %s28_s16 = sshll.u32 %s345_s15, 4  ;;  %s18_s18 = sshll.u32 %s346_s17, 4  ;;  %s29_s16 = int_to_ptr.vmem [resolvable:$true] %s28_s16  ;;  %s19_s18 = int_to_ptr.vmem [resolvable:$true] %s18_s18 }
   0x4   :  { %s251_s21 = scalar_lea.hbm %s433_s1, 128 }
   0x5   :  { %p252_p0 = scmp.ne.s32.totalorder %s433_s1, %s251_s21  ;;  %p255_p1 = scmp.lt.u32.totalorder %s251_s21, %s433_s1 }
   0x7   :  { %p257_p2 = pnand %p255_p1, %p252_p0 }
   0x9   :  { %260 = shalt.err (!%p257_p2)
}
   0xa   :  { %s261_s26 = scalar_lea.vmem %s29_s16, 128  ;;  %p266_p4 = scmp.lt.s32.totalorder %s29_s16, %s29_s16 }
   0xb   :  { %p262_p3 = scmp.ne.s32.totalorder %s29_s16, %s261_s26  ;;  %p267_p5 = scmp.lt.s32.totalorder %s261_s26, %s261_s26 }
   0xd   :  { %p268_p6 = por %p267_p5, %p266_p4 }
   0xf   :  { %p269_p7 = pnand %p268_p6, %p262_p3 }
  0x11   :  { %272 = shalt.err (!%p269_p7)
}
  0x12   :  { %31 = dma.hbm_to_vmem [thread:$0]  %s433_s1, 128, %s29_s16, [#allocation6]  }
  0x13   :  { %s273_s5 = scalar_lea.hbm %s432_s0, 128 }
  0x14   :  { %p274_p8 = scmp.ne.s32.totalorder %s432_s0, %s273_s5  ;;  %p277_p9 = scmp.lt.u32.totalorder %s273_s5, %s432_s0 }
  0x16   :  { %p279_p10 = pnand %p277_p9, %p274_p8 }
  0x18   :  { %282 = shalt.err (!%p279_p10)
}
  0x19   :  { %s283_s10 = scalar_lea.vmem %s19_s18, 128  ;;  %p288_p12 = scmp.lt.s32.totalorder %s19_s18, %s19_s18 }
  0x1a   :  { %p284_p11 = scmp.ne.s32.totalorder %s19_s18, %s283_s10  ;;  %p289_p13 = scmp.lt.s32.totalorder %s283_s10, %s283_s10 }
  0x1c   :  { %p290_p0 = por %p289_p13, %p288_p12 }
  0x1e   :  { %p291_p1 = pnand %p290_p0, %p284_p11 }
  0x20   :  { %294 = shalt.err (!%p291_p1)
}
  0x21   :  { %21 = dma.hbm_to_vmem [thread:$0]  %s432_s0, 128, %s19_s18, [#allocation3]  }
  0x22   :  { %s347_s12 = smov [#allocation7]   ;;  %s295_s16 = scalar_lea.hbm %s434_s2, 1536 }
  0x23   :  { %s37_s13 = sshll.u32 %s347_s12, 4  ;;  %p296_p2 = scmp.ne.s32.totalorder %s434_s2, %s295_s16  ;;  %s38_s13 = int_to_ptr.vmem [resolvable:$true] %s37_s13 }
  0x24   :  { %p299_p3 = scmp.lt.u32.totalorder %s295_s16, %s434_s2 }
  0x26   :  { %p301_p4 = pnand %p299_p3, %p296_p2 }
  0x28   :  { %304 = shalt.err (!%p301_p4)
}
  0x29   :  { %s305_s22 = scalar_lea.vmem %s38_s13, 1536  ;;  %p310_p6 = scmp.lt.s32.totalorder %s38_s13, %s38_s13 }
  0x2a   :  { %p306_p5 = scmp.ne.s32.totalorder %s38_s13, %s305_s22  ;;  %p311_p7 = scmp.lt.s32.totalorder %s305_s22, %s305_s22 }
  0x2c   :  { %p312_p8 = por %p311_p7, %p310_p6 }
  0x2e   :  { %p313_p9 = pnand %p312_p8, %p306_p5 }
  0x30   :  { %316 = shalt.err (!%p313_p9)
}
  0x31   :  { %s348_s0 = smov 128   ;;  %s349_s18 = smov 8  }
  0x32   :  { %43 = dma.hbm_to_vmem [thread:$0]  %s434_s2, 1536, %s38_s13, [#allocation6], %s348_s0, %s348_s0, %s349_s18  }
  0x33   :  { %339 = dma.done.wait [#allocation3], 128  }
  0x34   :  { %340 = vsyncadd [#allocation3], 4294967168 }
  0x35   :  { %341 = dma.done.wait [#allocation6], 1664  }
  0x36   :  { %342 = vsyncadd [#allocation6], 4294965632  ;;  %v350_v0 = vmov 0.0|0.0   ;;  %vm351_vm0 = vmmov 0   ;;  %v352_v1 = vmov 0.0   ;;  %v56_v2 = vld [vmem:[#allocation5] sm:$0xff] }
  0x37   :  { %222 = vmatprep.subr.bf16.mxu0 %v350_v0  ;;  %219 = vmatprep.mubr.msk.f32.mxu0 %vm351_vm0, %v352_v1  ;;  %v55_v3 = vld [vmem:[#allocation2] sm:$0xff]  ;;  %v70_v4 = vld [vmem:[#allocation7] sm:$0xff]  ;;  %s353_s25 = smov 32   ;;  %v71_v6 = vld [vmem:[#allocation7 + $0x8] sm:$0xff]  ;;  %s354_s2 = smov 64   ;;  %vm66_vm1 = vcmask 261120  }
  0x38   :  { %59 = vrot.lane.b32.xlu0 %v56_v2, %s353_s25  ;;  %v57_v5 = vmul.f32 %v56_v2, %v55_v3  ;;  %v72_v7 = vld [vmem:[#allocation7 + $0x10] sm:$0xff]  ;;  %v73_v8 = vld [vmem:[#allocation7 + $0x18] sm:$0xff]  ;;  %v223_v9 = vpack.c.bf16 %v71_v6, %v70_v4  ;;  %v74_v11 = vld [vmem:[#allocation7 + $0x20] sm:$0xff]  ;;  %vm68_vm2 = vcmask 523264   ;;  %vm89_vm3 = vcmask 785408   ;;  %s355_s28 = smov [#allocation8]  }
  0x39   :  { %v226_v10 = vpack.c.bf16 %v73_v8, %v72_v7  ;;  %v75_v12 = vld [vmem:[#allocation7 + $0x28] sm:$0xff]  ;;  %v76_v14 = vld [vmem:[#allocation7 + $0x30] sm:$0xff]  ;;  %v77_v15 = vld [vmem:[#allocation7 + $0x38] sm:$0xff]  ;;  %s170_s29 = sshll.u32 %s355_s28, 4  ;;  %s171_s29 = int_to_ptr.vmem [resolvable:$true] %s170_s29 }
  0x3a   :  { %224 = vmatpush3.bf16.msra.mxu0 %v223_v9  ;;  %v229_v13 = vpack.c.bf16 %v75_v12, %v74_v11  ;;  %v232_v16 = vpack.c.bf16 %v77_v15, %v76_v14  ;;  %v78_v17 = vld [vmem:[#allocation7 + $0x40] sm:$0xff]  ;;  %v79_v18 = vld [vmem:[#allocation7 + $0x48] sm:$0xff]  ;;  %v80_v20 = vld [vmem:[#allocation7 + $0x50] sm:$0xff]  ;;  %s317_s30 = scalar_lea.vmem %s171_s29, 128  ;;  %p322_p11 = scmp.lt.s32.totalorder %s171_s29, %s171_s29 }
  0x3b   :  { %225 = vmatprep.subr.bf16.mxu0 %v350_v0  ;;  %v235_v19 = vpack.c.bf16 %v79_v18, %v78_v17  ;;  %v81_v21 = vld [vmem:[#allocation7 + $0x58] sm:$0xff]  ;;  %v180_v27 = vld [vmem:[%s435_s3] ss:$0 sm:$0xff]  ;;  %p318_p10 = scmp.ne.s32.totalorder %s171_s29, %s317_s30  ;;  %p323_p12 = scmp.lt.s32.totalorder %s317_s30, %s317_s30 }
  0x3c   :  { %63 = vrot.lane.b32.xlu0 %v57_v5, %s354_s2  ;;  %v238_v22 = vpack.c.bf16 %v81_v21, %v80_v20 }
  0x3d   :  { %p324_p13 = por %p323_p12, %p322_p11 }
  0x3e   :  { %227 = vmatpush3.bf16.msra.mxu0 %v226_v10 }
  0x3f   :  { %228 = vmatprep.subr.bf16.mxu0 %v350_v0  ;;  %p325_p0 = pnand %p324_p13, %p318_p10 }
  0x42   :  { %230 = vmatpush3.bf16.msra.mxu0 %v229_v13 }
  0x43   :  { %231 = vmatprep.subr.bf16.mxu0 %v350_v0 }
  0x46   :  { %233 = vmatpush3.bf16.msra.mxu0 %v232_v16 }
  0x47   :  { %234 = vmatprep.subr.bf16.mxu0 %v350_v0 }
  0x4a   :  { %236 = vmatpush3.bf16.msra.mxu0 %v235_v19 }
  0x4b   :  { %237 = vmatprep.subr.bf16.mxu0 %v350_v0 }
  0x4e   :  { %239 = vmatpush3.bf16.msra.mxu0 %v238_v22 }
  0xaa   :  { %v60_v23 = vpop.permute.xlu0 %59 }
  0xab   :  { %v67_v24 = vsel %vm66_vm1, %v55_v3, %v60_v23 }
  0xae   :  { %v64_v25 = vpop.permute.xlu0 %63 }
  0xaf   :  { %v69_v26 = vsel %vm68_vm2, %v67_v24, %v64_v25 }
  0xb0   :  { %220 = vmatmul.mubr.msk.f32.vlgmr.msra.gmra.mrb[0].mxu0 %vm89_vm3, %v69_v26 }
 0x183   :  { %v159_v28 = vpop.f32.mrb[0].mxu0 }
 0x184   :  { %v160_v29 = vadd.f32 %v180_v27, %v159_v28  ;;  %v221_v30 = vpop.f32.mrb[1].mxu0 }
 0x186   :  { %163 = vst [vmem:[#allocation8] sm:$0xff] %v160_v29 }
 0x187   :  { %328 = shalt.err (!%p325_p0)
}
 0x188   :  { %s329_s7 = scalar_lea.hbm %s436_s4, 128 }
 0x189   :  { %p330_p1 = scmp.ne.s32.totalorder %s436_s4, %s329_s7  ;;  %p333_p2 = scmp.lt.u32.totalorder %s329_s7, %s436_s4 }
 0x18b   :  { %p335_p3 = pnand %p333_p2, %p330_p1 }
 0x18d   :  { %338 = shalt.err (!%p335_p3)
}
 0x18e   :  { %173 = dma.vmem_to_hbm [thread:$0]  %s171_s29, 128, %s436_s4, [#allocation4]  }
 0x18f   :  { %343 = dma.done.wait [#allocation4], 128  }
 0x190   :  { %344 = vsyncadd [#allocation4], 4294967168 }
 0x191   :  { %177 = vsyncpa [#allocation3], 1 }
 0x192   :  { %178 = vsyncpa [#allocation6], 1 }
 0x193   :  { %179 = vsyncpa [#allocation4], 1 }

</bundles_post_ra>
